<compile_context>
chip_gen: v7x
topology: tpu7x:2x2x1
jax: 0.10.0
libtpu: 0.0.40
codegen_flags: <defaults>
</compile_context>

<pallas_src>
import functools

import numpy as np

import jax
import jax.numpy as jnp
from jax.experimental import pallas as pl
from jax.experimental.pallas import tpu as pltpu


def _avg_smooth_kernel(scale_ref, x_ref, o_ref, *, k, h_out, w_out):
    """Separable box filter on P (H, W) planes; W on lanes, H on sublanes.

    scale_ref : SMEM (1,) f32      the uniform filter tap value (1/k^2)
    x_ref     : VMEM (P, H, W)     input block
    o_ref     : VMEM (P, h_out, w_out)
    """
    w_in = x_ref.shape[2]

    x = x_ref[...]
    x32 = x if x.dtype == jnp.float32 else x.astype(jnp.float32)  # one up-cast

    # Vertical (H / sublane) box sum: init from the dy=0 window (no zero-fill).
    vsum = x32[:, 0:h_out, :]
    for dy in range(1, k):
        vsum = vsum + x32[:, dy:dy + h_out, :]

    # Horizontal (W / lane) box sum: dx shifts done with XLU lane rolls against
    # a full-lane-width accumulator; wrapped lanes land at w >= w_out and are
    # dropped at the store, so no shifted/masked lane slices in the hot loop.
    hsum = vsum
    for dx in range(1, k):
        hsum = hsum + pltpu.roll(vsum, shift=w_in - dx, axis=2)

    # Single post-sum multiply by the uniform tap value (ones / k^2 filter).
    out = hsum[:, :, 0:w_out] * scale_ref[0]
    if out.dtype != o_ref.dtype:
        out = out.astype(o_ref.dtype)
    o_ref[...] = out


def average_smoothing(x, weight):
    """x: (N, C, H, W); weight: (C, 1, k, k) uniform averaging filter.
    Returns (N, C, H-k+1, W-k+1), equal to F.conv2d(x, weight, groups=C)."""
    n, c, h, w = x.shape
    cw, one, k, k2 = weight.shape
    assert cw == c and one == 1 and k == k2 and k <= h and k <= w

    h_out = h - k + 1
    w_out = w - k + 1

    # The kernel exploits that AverageSmoothing always builds a uniform filter
    # (every tap == 1/k^2): it computes a box sum and multiplies once by that
    # tap value.  Guard on uniformity when the weight is concrete.
    try:
        wnp = np.asarray(jax.device_get(weight))
    except Exception:  # traced under jit: trust the module's construction
        wnp = None
    if wnp is not None and not np.allclose(wnp, wnp.reshape(-1)[0]):
        # TODO(synk): general (non-uniform) depthwise weights would need a
        # per-tap path; AverageSmoothing never constructs them.
        raise NotImplementedError("average_smoothing requires a uniform filter")
    scale = jnp.reshape(weight, (-1,))[:1].astype(jnp.float32)  # (1,) scalar

    # NCHW-native spatial-on-lanes layout: (N, C, H, W) -> (N*C, H, W) planes.
    # Pure reshape (no transpose, no channel padding); W sits on the lane axis.
    num_planes = n * c
    x_planes = x.reshape(num_planes, h, w)

    # ---- block sizing ------------------------------------------------------
    # ~4 MiB f32 input block per step (well past the ~85%-of-roofline tile
    # size) and >= 8 grid steps when enough planes exist; p picked as
    # cdiv(NP, cdiv(NP, p_max)) so plane padding is negligible.
    h_vmem = ((h + 7) // 8) * 8
    w_vmem = ((w + 127) // 128) * 128
    plane_vmem_bytes = h_vmem * w_vmem * 4             # f32 plane in VMEM
    p_max = max(1, (4 * 1024 * 1024) // plane_vmem_bytes)
    min_steps = 8 if num_planes >= 8 else (2 if num_planes >= 2 else 1)
    p_max = max(1, min(p_max, max(1, num_planes // min_steps)))
    num_steps = pl.cdiv(num_planes, p_max)
    p = pl.cdiv(num_planes, num_steps)
    planes_pad = num_steps * p
    if planes_pad != num_planes:
        x_planes = jnp.pad(x_planes, ((0, planes_pad - num_planes), (0, 0), (0, 0)))
    # TODO(synk): for N*C == 1 an extra grid axis tiling H_out (with a k-1 row
    # halo) would be needed to keep both v7x TensorCores busy.

    kernel = functools.partial(_avg_smooth_kernel, k=k, h_out=h_out, w_out=w_out)

    cost = pl.CostEstimate(
        flops=(2 * (k - 1) + 1) * num_planes * h_out * w_out,
        transcendentals=0,
        bytes_accessed=(x_planes.size * x_planes.dtype.itemsize
                        + planes_pad * h_out * w_out * x.dtype.itemsize),
    )

    out_planes = pl.pallas_call(
        kernel,
        out_shape=jax.ShapeDtypeStruct((planes_pad, h_out, w_out), x.dtype),
        grid_spec=pltpu.PrefetchScalarGridSpec(
            num_scalar_prefetch=0,
            grid=(num_steps,),
            in_specs=[
                # uniform tap value: a 4-byte SMEM scalar (no per-step weight
                # tile DMA at all)
                pl.BlockSpec(memory_space=pltpu.MemorySpace.SMEM),
                # P full (H, W) planes per step
                pl.BlockSpec((p, h, w), lambda i: (i, 0, 0)),
            ],
            out_specs=pl.BlockSpec((p, h_out, w_out), lambda i: (i, 0, 0)),
        ),
        compiler_params=pltpu.CompilerParams(
            dimension_semantics=("parallel",),
            # blocks are <= ~4 MiB; 48 MiB leaves headroom inside v7x's
            # 64 MiB/TC and is far below v5e/v6e's 128 MiB.
            vmem_limit_bytes=48 * 1024 * 1024,
        ),
        cost_estimate=cost,
    )(scale, x_planes)

    return out_planes[:num_planes].reshape(n, c, h_out, w_out)


def make_average_smoothing_weight(channels, kernel_size):
    """Deterministic parameter init: matches AverageSmoothing.__init__."""
    kern = jnp.ones((kernel_size, kernel_size), jnp.float32) / float(
        kernel_size * kernel_size
    )
    kern = kern.reshape(1, 1, kernel_size, kernel_size)
    kern = jnp.tile(kern, (channels, 1, 1, 1))  # (C, 1, k, k)
    return kern


if __name__ == "__main__":
    # TODO(synk): only the dim=2 (conv2d) branch of the module is implemented.
    key = jax.random.PRNGKey(0)
    N, C, H, W = 2, 4, 16, 16
    kernel_size = 3

    x = jax.random.normal(key, (N, C, H, W), dtype=jnp.float32)
    weight = make_average_smoothing_weight(C, kernel_size)

    out = jax.block_until_ready(average_smoothing(x, weight))

    # pure-JAX reference (depthwise conv, VALID padding, stride 1)
    ref = jax.lax.conv_general_dilated(
        x,
        weight,
        window_strides=(1, 1),
        padding="VALID",
        dimension_numbers=("NCHW", "OIHW", "NCHW"),
        feature_group_count=C,
    )

    assert out.shape == (N, C, H - kernel_size + 1, W - kernel_size + 1)
    assert jnp.allclose(out, ref, atol=1e-5, rtol=1e-5)
    print("KERNEL_OK")
</pallas_src>

<mosaic_0001>
module attributes {stable_mosaic.version = 11 : i64} {
  func.func @_avg_smooth_kernel(%arg0: i32, %arg1: memref<1xf32, #tpu.memory_space<smem>>, %arg2: memref<1x16x16xf32, #tpu.memory_space<vmem>>, %arg3: memref<1x14x14xf32, #tpu.memory_space<vmem>>) attributes {dimension_semantics = [#tpu.dimension_semantics<parallel>], iteration_bounds = array<i64: 8>, scalar_prefetch = 0 : i64, scratch_operands = 0 : i64, tpu.core_type = #tpu.core_type<tc>, window_params = [{transform_indices = @transform_0, window_bounds = array<i64: 1>}, {transform_indices = @transform_1, window_bounds = array<i64: 1, 16, 16>}, {transform_indices = @transform_2, window_bounds = array<i64: 1, 14, 14>}]} {
    %c0 = arith.constant 0 : index
    %c0_0 = arith.constant 0 : index
    %c0_1 = arith.constant 0 : index
    %0 = vector.load %arg2[%c0, %c0_0, %c0_1] : memref<1x16x16xf32, #tpu.memory_space<vmem>>, vector<1x16x16xf32>
    %1 = vector.extract_strided_slice %0 {offsets = [0, 0, 0], sizes = [1, 14, 16], strides = [1, 1, 1]} : vector<1x16x16xf32> to vector<1x14x16xf32>
    %2 = vector.extract_strided_slice %0 {offsets = [0, 1, 0], sizes = [1, 14, 16], strides = [1, 1, 1]} : vector<1x16x16xf32> to vector<1x14x16xf32>
    %3 = arith.addf %1, %2 : vector<1x14x16xf32>
    %4 = vector.extract_strided_slice %0 {offsets = [0, 2, 0], sizes = [1, 14, 16], strides = [1, 1, 1]} : vector<1x16x16xf32> to vector<1x14x16xf32>
    %5 = arith.addf %3, %4 : vector<1x14x16xf32>
    %c15_i32 = arith.constant 15 : i32
    %6 = tpu.dynamic_rotate %5 by %c15_i32 dim 2 : vector<1x14x16xf32>, i32 -> vector<1x14x16xf32>
    %7 = arith.addf %5, %6 : vector<1x14x16xf32>
    %c14_i32 = arith.constant 14 : i32
    %8 = tpu.dynamic_rotate %5 by %c14_i32 dim 2 : vector<1x14x16xf32>, i32 -> vector<1x14x16xf32>
    %9 = arith.addf %7, %8 : vector<1x14x16xf32>
    %10 = vector.extract_strided_slice %9 {offsets = [0, 0, 0], sizes = [1, 14, 14], strides = [1, 1, 1]} : vector<1x14x16xf32> to vector<1x14x14xf32>
    %c0_2 = arith.constant 0 : index
    %11 = memref.load %arg1[%c0_2] : memref<1xf32, #tpu.memory_space<smem>>
    %12 = vector.broadcast %11 : f32 to vector<1x14x14xf32>
    %13 = arith.mulf %10, %12 : vector<1x14x14xf32>
    %c0_3 = arith.constant 0 : index
    %c0_4 = arith.constant 0 : index
    %c0_5 = arith.constant 0 : index
    %14 = vector.load %arg3[%c0_3, %c0_4, %c0_5] : memref<1x14x14xf32, #tpu.memory_space<vmem>>, vector<1x14x14xf32>
    tpu.vector_store %arg3[%c0_3, %c0_4, %c0_5], %13 {strides = array<i32>} : memref<1x14x14xf32, #tpu.memory_space<vmem>>, vector<1x14x14xf32>,
    return
  }
  func.func @transform_0(%arg0: i32) -> i32 {
    %c0_i32 = arith.constant 0 : i32
    %c0_i32_0 = arith.constant 0 : i32
    return %c0_i32 : i32
  }
  func.func @transform_1(%arg0: i32) -> (i32, i32, i32) {
    %c0_i32 = arith.constant 0 : i32
    %c0_i32_0 = arith.constant 0 : i32
    %c0_i32_1 = arith.constant 0 : i32
    return %arg0, %c0_i32, %c0_i32_0 : i32, i32, i32
  }
  func.func @transform_2(%arg0: i32) -> (i32, i32, i32) {
    %c0_i32 = arith.constant 0 : i32
    %c0_i32_0 = arith.constant 0 : i32
    %c0_i32_1 = arith.constant 0 : i32
    return %arg0, %c0_i32, %c0_i32_0 : i32, i32, i32
  }
}

</mosaic_0001>

<bundles_post_ra>
// kernel: tpu_custom_call.1
= control target key start
LH: loop header
LB: loop body
LE: loop exit
PB: predicated region body
PF: predicated region fallthrough
CT: control target
= control target key end

     0   :  { %s547_s0 = inlined_call_operand.<no memory space> [shape: f32[1], index: 0, kind: input, shape index: {}]   ;;  %s548_s1 = inlined_call_operand.hbm [shape: f32[8,16,16], index: 1, kind: input, shape index: {}]   ;;  %s549_s2 = inlined_call_operand.vmem [shape: f32[8,14,14], index: 2, kind: output, shape index: {}]  }
   0x1   :  { %7 = sst [smem:[#allocation2]] %s547_s0 }
   0x2   :  { %8 = vsyncpa [#allocation4], 0 }
   0x3   :  { %10 = vsyncpa [#allocation4 + $0x1], 0  ;;  %s439_s11 = smov 0   ;;  %s441_s12 = smov 0  }
   0x4   :  { %s443_s13 = smov 0   ;;  %s445_s14 = smov 0  }
   0x5 LB: > { %s458_s0 = sadd.s32 4294967295, %s413_s14   ;;  %s461_s15 = sadd.s32 1, %s413_s14   ;;  %s413_s14 = sphi %s445_s14, %s556_s14   ;;  %s409_s13 = sphi %s443_s13, %s555_s13   ;;  %s405_s12 = sphi %s441_s12, %s554_s12   ;;  %s401_s11 = sphi %s439_s11, %s553_s11  }
   0x6   : > { %s41_s16 = ssub.s32 %s413_s14, %s461_s15  ;;  %s44_s17 = sadd.s32 1, %s409_s13 }
   0x7   : > { %p42_p0 = scmp.eq.s32.totalorder %s41_s16, 0  ;;  %p51_p1 = scmp.ne.s32.totalorder %s409_s13, %s405_s12 }
   0x8   : > { %p52_p2 = scmp.eq.s32.totalorder %s413_s14, 0  ;;  %p57_p3 = scmp.ne.s32.totalorder %s405_s12, %s401_s11 }
   0x9   : > { %s471_s18 = scalar_select %p42_p0, %s409_s13, %s44_s17  }
   0xa   : > { %p53_p4 = por %p52_p2, %p51_p1  ;;  %p58_p5 = scmp.eq.s32.totalorder %s458_s0, 0 }
   0xb   : > { %p311_p6 = scmp.lt.s32.totalorder %s413_s14, 8  ;;  %s110_s20 = sand.u32 1, %s409_s13  }
   0xc   : > { %p475_p7 = por %p58_p5, %p57_p3  ;;  %s294_s21 = sshll.u32 %s110_s20, 4 }
   0xd   : > { %s303_s22 = sshll.u32 %s413_s14, 8  ;;  %s114_s26 = scalar_lea.vmem [#allocation3], %s294_s21 }
   0xe   : > { %s484_s25 = scalar_lea.hbm %s548_s1, %s303_s22  ;;  %s121_s27 = sshll.u32 %s114_s26, 4  ;;  %s486_s27 = int_to_ptr.vmem [resolvable:$true] %s121_s27 }
   0xf   : > { %p488_p8 = pnand %p311_p6, %p53_p4  ;;  %s493_s29 = scalar_lea.sflag [#allocation4], %s110_s20 }
  0x10   : > { %s349_s30 = scalar_lea.hbm %s484_s25, 256  ;;  %s354_s5 = scalar_lea.hbm %s548_s1, 2048 }
  0x11   : > { %p350_p10 = scmp.ne.s32.totalorder %s484_s25, %s349_s30  ;;  %p351_p11 = pneg %p488_p8 }
  0x12   : > { %p355_p0 = scmp.lt.u32.totalorder %s484_s25, %s548_s1  ;;  %p356_p1 = scmp.lt.u32.totalorder %s354_s5, %s349_s30 }
  0x13   : > { %p352_p12 = pnand %p351_p11, %p350_p10  ;;  %p358_p3 = scmp.lt.u32.totalorder %s349_s30, %s484_s25 }
  0x14   : > { %p357_p2 = por %p356_p1, %p355_p0 }
  0x15   : > { %p353_p13 = pneg %p352_p12 }
  0x16   : > { %p359_p4 = por %p358_p3, %p357_p2 }
  0x18   : > { %p360_p5 = pnand %p359_p4, %p353_p13 }
  0x1a   : > { %363 = shalt.err (!%p360_p5)
}
  0x1b   : > { %s364_s8 = scalar_lea.vmem %s486_s27, 256  ;;  %s415_s9 = smov [#allocation3]  }
  0x1c   : > { %p365_p6 = scmp.ne.s32.totalorder %s486_s27, %s364_s8  ;;  %s369_s10 = sshll.u32 %s415_s9, 4  ;;  %s370_s10 = int_to_ptr.vmem [resolvable:$false] %s369_s10 }
  0x1d   : > { %s371_s11 = scalar_lea.vmem %s370_s10, 512  ;;  %p372_p9 = scmp.lt.s32.totalorder %s486_s27, %s370_s10 }
  0x1e   : > { %p367_p10 = pnand %p365_p6, %p351_p11  ;;  %p373_p0 = scmp.lt.s32.totalorder %s371_s11, %s364_s8 }
  0x20   : > { %p368_p12 = pneg %p367_p10  ;;  %p374_p1 = por %p373_p0, %p372_p9 }
  0x22   : > { %p375_p2 = pnand %p374_p1, %p368_p12 }
  0x24   : > { %378 = shalt.err (!%p375_p2)
}
  0x25   : > { %s416_s16 = smov 128   ;;  %s417_s17 = smov 8  }
  0x26   : > { %310 = dma.hbm_to_vmem [thread:$0]  (!%p488_p8), %s484_s25, 256, %s486_s27, %s493_s29, %s416_s16, %s416_s16, %s417_s17  }
  0x27   : > { %p129_p11 = scmp.lt.s32.totalorder %s413_s14, 9  ;;  %p552_p13 = scmp.ge.s32.totalorder %s413_s14, 1 }
  0x29   : > { %p130_p3 = pnand %p552_p13, %p129_p11 }
  0x2a   : > { %s135_s20 = sand.u32 (!%p130_p3), 1, %s405_s12  }
  0x2b   : > { %133 = sbr.rel (%p130_p3) target bundleno = 419 (0x1a3), region = 28  ;;  %s298_s21 = sshll.u32 (!%p130_p3), %s135_s20, 4 }
  0x2c   : > { %s136_s22 = scalar_lea.sflag (!%p130_p3), [#allocation4], %s135_s20  ;;  %s139_s23 = scalar_lea.vmem (!%p130_p3), [#allocation3], %s298_s21 }
  0x32   : > { %396 = dma.done.wait (%p475_p7), %s136_s22, 256  }
  0x33   : > { %398 = vsyncadd (%p475_p7), %s136_s22, 4294967040  ;;  %v165_v0 = vld [vmem:[%s139_s23] sm:$0xff]  ;;  %v166_v1 = vld [vmem:[%s139_s23 + $0x8] sm:$0xff]  ;;  %vm169_vm0 = vcmask 1046528   ;;  %vm177_vm1 = vcmask 1045504   ;;  %s418_s14 = smov 16  }
  0x34   : > { %v170_v2 = vrot.slane %v165_v0, 1  ;;  %v171_v3 = vrot.slane %v166_v1, 1  ;;  %v178_v4 = vrot.slane %v165_v0, 2  ;;  %v179_v5 = vrot.slane %v166_v1, 2  ;;  %s419_s19 = smov 127   ;;  %s420_s24 = smov 126  }
  0x35   : > { %vm185_vm2 = vcmask 1047680   ;;  %p160_p7 = scmp.lt.s32.totalorder %s458_s0, 7  ;;  %s216_s25 = sld [smem:[#allocation2]]  ;;  %vm220_vm3 = vcmask 113664   ;;  %vm222_vm4 = vcmask 111616  }
  0x36   : > { %v172_v6 = vsel %vm169_vm0, %v170_v2, %v171_v3  ;;  %v180_v7 = vsel %vm177_vm1, %v178_v4, %v179_v5  ;;  %v176_v9 = vadd.f32 %v171_v3, %v166_v1 }
  0x37   : > { %v175_v8 = vadd.f32 %v172_v6, %v165_v0  ;;  %s558_s0 = smov (!%p160_p7, %s458_s0), 7 }
  0x38   : > { %v184_v11 = vadd.f32 %v179_v5, %v176_v9  ;;  %s304_s26 = sshll.u32 %s558_s0, 4 }
  0x39   : > { %v183_v10 = vadd.f32 %v180_v7, %v175_v8  ;;  %s164_s29 = scalar_lea.vmem %s549_s2, %s304_s26 }
  0x3b   : > { %186 = vrot.lane.b32.xlu0 %v183_v10, %s418_s14  ;;  %v217_v23 = vstv %s216_s25 }
  0x3f   : > { %189 = vrot.lane.b32.xlu0 %v184_v11, %s418_s14 }
  0xad   : > { %v187_v12 = vpop.permute.xlu0 %186 }
  0xae   : > { %v188_v13 = vsel %vm185_vm2, %v187_v12, %v183_v10 }
  0xaf   : > { %192 = vrot.lane.b32.xlu1 %v188_v13, %s418_s14 }
  0xb1   : > { %v190_v14 = vpop.permute.xlu0 %189 }
  0xb2   : > { %v191_v15 = vsel %vm185_vm2, %v190_v14, %v184_v11 }
  0xb3   : > { %194 = vrot.lane.b32.xlu1 %v191_v15, %s418_s14 }
 0x121   : > { %v193_v16 = vpop.permute.xlu1 %192 }
 0x122   : > { %v196_v17 = vsel %vm185_vm2, %v193_v16, %v183_v10 }
 0x123   : > { %200 = vrot.lane.b32.xlu0 %v196_v17, %s419_s19 }
 0x125   : > { %v195_v18 = vpop.permute.xlu1 %194 }
 0x126   : > { %v197_v19 = vsel %vm185_vm2, %v195_v18, %v184_v11 }
 0x127   : > { %208 = vrot.lane.b32.xlu0 %v196_v17, %s420_s24  ;;  %202 = vrot.lane.b32.xlu1 %v197_v19, %s419_s19 }
 0x12b   : > { %210 = vrot.lane.b32.xlu1 %v197_v19, %s420_s24 }
 0x195   : > { %v201_v20 = vpop.permute.xlu0 %200 }
 0x196   : > { %v206_v21 = vadd.f32 %v201_v20, %v183_v10 }
 0x199   : > { %v203_v22 = vpop.permute.xlu1 %202  ;;  %v209_v24 = vpop.permute.xlu0 %208 }
 0x19a   : > { %v214_v25 = vadd.f32 %v209_v24, %v206_v21  ;;  %v207_v26 = vadd.f32 %v203_v22, %v184_v11 }
 0x19c   : > { %v218_v27 = vmul.f32 %v217_v23, %v214_v25 }
 0x19d   : > { %v211_v28 = vpop.permute.xlu1 %210 }
 0x19e   : > { %221 = vst.msk [vmem:[%s164_s29] sm:$0xff] %vm220_vm3, %v218_v27  ;;  %v215_v29 = vadd.f32 %v211_v28, %v207_v26 }
 0x1a0   : > { %v219_v30 = vmul.f32 %v217_v23, %v215_v29 }
 0x1a2   : > { %223 = vst.msk [vmem:[%s164_s29 + $0x8] sm:$0x3f] %vm222_vm4, %v219_v30 }
 0x1a3 PF: > { %p13_p8 = scmp.ge.s32.totalorder %s461_s15, 10   ;;  %s553_s11 = smov %s405_s12 }
 0x1a4   : > { %s554_s12 = smov %s409_s13  ;;  %s555_s13 = smov %s471_s18 }
 0x1a5   : > { %s556_s14 = smov %s461_s15  ;;  %15 = sbr.rel (!%p13_p8) target bundleno = 5 (0x5), region = 68 }
 0x1ac   :  { %245 = vsyncpa [#allocation4], 1 }
 0x1ad   :  { %247 = vsyncpa [#allocation4 + $0x1], 1 }

</bundles_post_ra>
